<compile_context>
chip_gen: v7x
topology: tpu7x:2x2x1
jax: 0.10.0
libtpu: 0.0.40
codegen_flags: <defaults>
</compile_context>

<pallas_src>
import functools

import jax
import jax.numpy as jnp
from jax.experimental import pallas as pl
from jax.experimental.pallas import tpu as pltpu

LANE = 128  # padded lane width used for hidden / action / value dims


def _round_up(x, m):
    return ((x + m - 1) // m) * m


def actor_critic_kernel(x_ref, slab_ref, out_ref, *, n_action, L):
    """Fused actor+critic MLP over lane-padded operands.

    x_ref    : (TB, L)          lane-padded observations (real features in [0:n_state])
    slab_ref : (3*L + 8, L)     packed [W1; W2; W3; bias-rows] weight slab
    out_ref  : (TB, L)          lanes [0:n_action]=softmax probs, lane n_action=value, rest 0
    """
    x = x_ref[...]

    # Static views into the single packed weight slab (no extra DMAs, no layout fixup).
    w1 = slab_ref[0:L, :]
    w2 = slab_ref[L:2 * L, :]
    w3 = slab_ref[2 * L:3 * L, :]
    bias = slab_ref[3 * L:3 * L + 8, :]
    b1 = bias[0:1, :]
    b2 = bias[1:2, :]
    b3 = bias[2:3, :]

    # Three fused MXU passes (actor + critic share each pass via block structure).
    h1 = jnp.tanh(jnp.dot(x, w1, preferred_element_type=jnp.float32) + b1)
    h2 = jnp.tanh(jnp.dot(h1, w2, preferred_element_type=jnp.float32) + b2)
    y = jnp.dot(h2, w3, preferred_element_type=jnp.float32) + b3      # (TB, L)

    # Lane-dense masked softmax over the first n_action lanes; value sits in lane n_action.
    lane = jax.lax.broadcasted_iota(jnp.int32, y.shape, 1)
    logits = jnp.where(lane < n_action, y, jnp.float32(-1e30))
    m = jnp.max(logits, axis=1, keepdims=True)
    e = jnp.exp(logits - m)                         # exactly 0 on padded lanes
    s = jnp.sum(e, axis=1, keepdims=True)
    inv = pl.reciprocal(s, approx=True)             # EUP slot (free next to exp)
    inv = inv * (2.0 - s * inv)                     # one Newton step -> ~f32-exact
    probs = e * inv

    out_ref[...] = probs + jnp.where(lane == n_action, y, 0.0)


def pack_weight_slab(params, n_state, hidden, n_action, L=LANE):
    """Pack the 12 actor+critic tensors into one lane-padded f32 slab of shape (3*L+8, L)."""
    assert n_state <= L and 2 * hidden <= L and n_action + 1 <= L

    w1 = jnp.zeros((L, L), jnp.float32)                       # [x] -> [actor_h | critic_h]
    w1 = w1.at[:n_state, :hidden].set(params["aw1"])
    w1 = w1.at[:n_state, hidden:2 * hidden].set(params["cw1"])

    w2 = jnp.zeros((L, L), jnp.float32)                       # block-diagonal hidden layer
    w2 = w2.at[:hidden, :hidden].set(params["aw2"])
    w2 = w2.at[hidden:2 * hidden, hidden:2 * hidden].set(params["cw2"])

    w3 = jnp.zeros((L, L), jnp.float32)                       # -> [logits | value | 0...]
    w3 = w3.at[:hidden, :n_action].set(params["aw3"])
    w3 = w3.at[hidden:2 * hidden, n_action:n_action + 1].set(params["cw3"])

    bias = jnp.zeros((8, L), jnp.float32)                     # one 8-row sublane tile
    bias = bias.at[0, :hidden].set(params["ab1"][0])
    bias = bias.at[0, hidden:2 * hidden].set(params["cb1"][0])
    bias = bias.at[1, :hidden].set(params["ab2"][0])
    bias = bias.at[1, hidden:2 * hidden].set(params["cb2"][0])
    bias = bias.at[2, :n_action].set(params["ab3"][0])
    bias = bias.at[2, n_action].set(params["cb3"][0, 0])

    return jnp.concatenate([w1, w2, w3, bias], axis=0)        # (3*L + 8, L)


def actor_critic_forward(x, params):
    """Fused actor+critic forward. Returns (value, probs) mirroring (value, Categorical(probs)).

    NOTE: at batch~8 the call is fixed-overhead bound; for real PPO rollouts batch many
    envs/steps per call so the resident weight slab and launch cost are amortized.
    """
    batch, n_state = x.shape
    hidden = params["aw1"].shape[1]
    n_action = params["aw3"].shape[1]
    L = LANE

    slab = pack_weight_slab(params, n_state, hidden, n_action, L)

    # Batch tiling: tiny batches -> one full block; large batches -> 256-row tiles
    # sharded across TensorCores via the "parallel" grid axis.
    if batch <= 256:
        tb = max(8, _round_up(batch, 8))
        batch_pad = tb
    else:
        tb = 256
        batch_pad = _round_up(batch, tb)

    x_pad = jnp.zeros((batch_pad, L), jnp.float32)
    x_pad = x_pad.at[:batch, :n_state].set(x.astype(jnp.float32))

    kernel = functools.partial(actor_critic_kernel, n_action=n_action, L=L)
    out = pl.pallas_call(
        kernel,
        out_shape=jax.ShapeDtypeStruct((batch_pad, L), jnp.float32),
        grid=(batch_pad // tb,),
        in_specs=[
            pl.BlockSpec((tb, L), lambda i: (i, 0)),          # streamed observations
            pl.BlockSpec((3 * L + 8, L), lambda i: (0, 0)),   # weight slab stays resident
        ],
        out_specs=pl.BlockSpec((tb, L), lambda i: (i, 0)),
        compiler_params=pltpu.CompilerParams(
            dimension_semantics=("parallel",)),
    )(x_pad, slab)

    probs = out[:batch, :n_action]
    value = out[:batch, n_action:n_action + 1]
    return value, probs


def init_params(key, n_state, n_action, hidden=30):
    """Deterministic synthetic parameters (shapes match the PyTorch module)."""
    ks = jax.random.split(key, 12)

    def lin(kw, kb, fan_in, fan_out):
        # Uniform(-1/sqrt(fan_in), 1/sqrt(fan_in)) like torch.nn.Linear default init.
        bound = 1.0 / jnp.sqrt(jnp.float32(fan_in))
        w = jax.random.uniform(kw, (fan_in, fan_out), jnp.float32, -bound, bound)
        b = jax.random.uniform(kb, (1, fan_out), jnp.float32, -bound, bound)
        return w, b

    aw1, ab1 = lin(ks[0], ks[1], n_state, hidden)
    aw2, ab2 = lin(ks[2], ks[3], hidden, hidden)
    aw3, ab3 = lin(ks[4], ks[5], hidden, n_action)
    cw1, cb1 = lin(ks[6], ks[7], n_state, hidden)
    cw2, cb2 = lin(ks[8], ks[9], hidden, hidden)
    cw3, cb3 = lin(ks[10], ks[11], hidden, 1)
    return dict(
        aw1=aw1, ab1=ab1, aw2=aw2, ab2=ab2, aw3=aw3, ab3=ab3,
        cw1=cw1, cb1=cb1, cw2=cw2, cb2=cb2, cw3=cw3, cb3=cb3,
    )


def reference_forward(x, p):
    """Pure-JAX reference for correctness checking."""
    h = jnp.tanh(x @ p["aw1"] + p["ab1"])
    h = jnp.tanh(h @ p["aw2"] + p["ab2"])
    logits = h @ p["aw3"] + p["ab3"]
    probs = jax.nn.softmax(logits, axis=1)
    hc = jnp.tanh(x @ p["cw1"] + p["cb1"])
    hc = jnp.tanh(hc @ p["cw2"] + p["cb2"])
    value = hc @ p["cw3"] + p["cb3"]
    return value, probs


if __name__ == "__main__":
    # Small shapes consistent with an RL ActorCritic: batch=8 observations,
    # n_state=16 features, n_action=6, hidden layers [30, 30].
    key = jax.random.PRNGKey(0)
    k_x, k_p = jax.random.split(key)
    batch, n_state, n_action = 8, 16, 6

    x = jax.random.normal(k_x, (batch, n_state), dtype=jnp.float32)
    params = init_params(k_p, n_state, n_action, hidden=30)

    value, probs = actor_critic_forward(x, params)
    value = jax.block_until_ready(value)
    probs = jax.block_until_ready(probs)

    # Sanity check against pure-JAX reference.
    v_ref, p_ref = reference_forward(x, params)
    assert value.shape == (batch, 1) and probs.shape == (batch, n_action)
    assert jnp.allclose(value, v_ref, atol=1e-5, rtol=1e-5)
    assert jnp.allclose(probs, p_ref, atol=1e-5, rtol=1e-5)
    assert jnp.allclose(jnp.sum(probs, axis=1), 1.0, atol=1e-5)

    print("KERNEL_OK")
</pallas_src>

<mosaic_0001>
module attributes {stable_mosaic.version = 11 : i64} {
  func.func @actor_critic_kernel(%arg0: i32, %arg1: memref<8x128xf32, #tpu.memory_space<vmem>>, %arg2: memref<392x128xf32, #tpu.memory_space<vmem>>, %arg3: memref<8x128xf32, #tpu.memory_space<vmem>>) attributes {dimension_semantics = [#tpu.dimension_semantics<parallel>], iteration_bounds = array<i64: 1>, scalar_prefetch = 0 : i64, scratch_operands = 0 : i64, tpu.core_type = #tpu.core_type<tc>, window_params = [{transform_indices = @transform_0, window_bounds = array<i64: 8, 128>}, {pipeline_mode = #tpu.pipeline_mode<synchronous>, transform_indices = @transform_1, window_bounds = array<i64: 392, 128>}, {transform_indices = @transform_2, window_bounds = array<i64: 8, 128>}]} {
    %c0 = arith.constant 0 : index
    %c0_0 = arith.constant 0 : index
    %0 = vector.load %arg1[%c0, %c0_0] : memref<8x128xf32, #tpu.memory_space<vmem>>, vector<8x128xf32>
    %c0_1 = arith.constant 0 : index
    %c0_2 = arith.constant 0 : index
    %1 = vector.load %arg2[%c0_1, %c0_2] : memref<392x128xf32, #tpu.memory_space<vmem>>, vector<128x128xf32>
    %c128 = arith.constant 128 : index
    %c0_3 = arith.constant 0 : index
    %2 = vector.load %arg2[%c128, %c0_3] : memref<392x128xf32, #tpu.memory_space<vmem>>, vector<128x128xf32>
    %c256 = arith.constant 256 : index
    %c0_4 = arith.constant 0 : index
    %3 = vector.load %arg2[%c256, %c0_4] : memref<392x128xf32, #tpu.memory_space<vmem>>, vector<128x128xf32>
    %c384 = arith.constant 384 : index
    %c0_5 = arith.constant 0 : index
    %4 = vector.load %arg2[%c384, %c0_5] : memref<392x128xf32, #tpu.memory_space<vmem>>, vector<8x128xf32>
    %5 = vector.extract_strided_slice %4 {offsets = [0, 0], sizes = [1, 128], strides = [1, 1]} : vector<8x128xf32> to vector<1x128xf32>
    %6 = vector.extract_strided_slice %4 {offsets = [1, 0], sizes = [1, 128], strides = [1, 1]} : vector<8x128xf32> to vector<1x128xf32>
    %7 = vector.extract_strided_slice %4 {offsets = [2, 0], sizes = [1, 128], strides = [1, 1]} : vector<8x128xf32> to vector<1x128xf32>
    %cst = arith.constant dense<0.000000e+00> : vector<8x128xf32>
    %8 = tpu.matmul %0, %1, %cst {dimension_numbers = #tpu.dot_dimension_numbers<[1], [0], [0], [1], [0, 0, 1, 1], [], []>} : vector<8x128xf32>, vector<128x128xf32>, vector<8x128xf32> -> vector<8x128xf32>
    %9 = vector.broadcast %5 : vector<1x128xf32> to vector<8x128xf32>
    %10 = arith.addf %8, %9 : vector<8x128xf32>
    %11 = math.tanh %10 : vector<8x128xf32>
    %cst_6 = arith.constant dense<0.000000e+00> : vector<8x128xf32>
    %12 = tpu.matmul %11, %2, %cst_6 {dimension_numbers = #tpu.dot_dimension_numbers<[1], [0], [0], [1], [0, 0, 1, 1], [], []>} : vector<8x128xf32>, vector<128x128xf32>, vector<8x128xf32> -> vector<8x128xf32>
    %13 = vector.broadcast %6 : vector<1x128xf32> to vector<8x128xf32>
    %14 = arith.addf %12, %13 : vector<8x128xf32>
    %15 = math.tanh %14 : vector<8x128xf32>
    %cst_7 = arith.constant dense<0.000000e+00> : vector<8x128xf32>
    %16 = tpu.matmul %15, %3, %cst_7 {dimension_numbers = #tpu.dot_dimension_numbers<[1], [0], [0], [1], [0, 0, 1, 1], [], []>} : vector<8x128xf32>, vector<128x128xf32>, vector<8x128xf32> -> vector<8x128xf32>
    %17 = vector.broadcast %7 : vector<1x128xf32> to vector<8x128xf32>
    %18 = arith.addf %16, %17 : vector<8x128xf32>
    %19 = tpu.iota {dimensions = array<i32: 1>} : vector<8x128xi32>
    %c6_i32 = arith.constant 6 : i32
    %20 = vector.broadcast %c6_i32 : i32 to vector<8x128xi32>
    %21 = arith.cmpi slt, %19, %20 : vector<8x128xi32>
    %cst_8 = arith.constant -1.000000e+30 : f32
    %22 = vector.broadcast %cst_8 : f32 to vector<8x128xf32>
    %23 = arith.select %21, %18, %22 : vector<8x128xi1>, vector<8x128xf32>
    %cst_9 = arith.constant dense<0xFF800000> : vector<8xf32>
    %24 = vector.multi_reduction <maximumf>, %23, %cst_9 [1] : vector<8x128xf32> to vector<8xf32>
    %25 = vector.shape_cast %24 : vector<8xf32> to vector<8x1xf32>
    %26 = vector.broadcast %25 : vector<8x1xf32> to vector<8x128xf32>
    %27 = arith.subf %23, %26 : vector<8x128xf32>
    %28 = math.exp %27 : vector<8x128xf32>
    %cst_10 = arith.constant dense<0.000000e+00> : vector<8xf32>
    %29 = vector.multi_reduction <add>, %28, %cst_10 [1] : vector<8x128xf32> to vector<8xf32>
    %30 = vector.shape_cast %29 : vector<8xf32> to vector<8x1xf32>
    %31 = tpu.reciprocal %30 {approx = true} : vector<8x1xf32> -> vector<8x1xf32>
    %32 = arith.mulf %30, %31 : vector<8x1xf32>
    %cst_11 = arith.constant 2.000000e+00 : f32
    %33 = vector.broadcast %cst_11 : f32 to vector<8x1xf32>
    %34 = arith.subf %33, %32 : vector<8x1xf32>
    %35 = arith.mulf %31, %34 : vector<8x1xf32>
    %36 = vector.broadcast %35 : vector<8x1xf32> to vector<8x128xf32>
    %37 = arith.mulf %28, %36 : vector<8x128xf32>
    %c6_i32_12 = arith.constant 6 : i32
    %38 = vector.broadcast %c6_i32_12 : i32 to vector<8x128xi32>
    %39 = arith.cmpi eq, %19, %38 : vector<8x128xi32>
    %cst_13 = arith.constant 0.000000e+00 : f32
    %40 = vector.broadcast %cst_13 : f32 to vector<8x128xf32>
    %41 = arith.select %39, %18, %40 : vector<8x128xi1>, vector<8x128xf32>
    %42 = arith.addf %37, %41 : vector<8x128xf32>
    %c0_14 = arith.constant 0 : index
    %c0_15 = arith.constant 0 : index
    %43 = vector.load %arg3[%c0_14, %c0_15] : memref<8x128xf32, #tpu.memory_space<vmem>>, vector<8x128xf32>
    tpu.vector_store %arg3[%c0_14, %c0_15], %42 {strides = array<i32>} : memref<8x128xf32, #tpu.memory_space<vmem>>, vector<8x128xf32>,
    return
  }
  func.func @transform_0(%arg0: i32) -> (i32, i32) {
    %c0_i32 = arith.constant 0 : i32
    %c0_i32_0 = arith.constant 0 : i32
    return %arg0, %c0_i32 : i32, i32
  }
  func.func @transform_1(%arg0: i32) -> (i32, i32) {
    %c0_i32 = arith.constant 0 : i32
    %c0_i32_0 = arith.constant 0 : i32
    %c0_i32_1 = arith.constant 0 : i32
    return %c0_i32, %c0_i32_0 : i32, i32
  }
  func.func @transform_2(%arg0: i32) -> (i32, i32) {
    %c0_i32 = arith.constant 0 : i32
    %c0_i32_0 = arith.constant 0 : i32
    return %arg0, %c0_i32 : i32, i32
  }
}

</mosaic_0001>

<bundles_post_ra>
// kernel: tpu_custom_call.1
= control target key start
LH: loop header
LB: loop body
LE: loop exit
PB: predicated region body
PF: predicated region fallthrough
CT: control target
= control target key end

     0   :  { %7 = vsyncpa [#allocation3], 0  ;;  %s760_s0 = inlined_call_operand.hbm [shape: f32[8,128], index: 0, kind: input, shape index: {}]   ;;  %s761_s1 = inlined_call_operand.hbm [shape: f32[392,128], index: 1, kind: input, shape index: {}]   ;;  %s762_s2 = inlined_call_operand.hbm [shape: f32[8,128], index: 2, kind: output, shape index: {}]  }
   0x1   :  { %8 = vsyncpa [#allocation6], 0 }
   0x2   :  { %9 = vsyncpa [#allocation4], 0  ;;  %s664_s9 = smov [#allocation2]   ;;  %s665_s11 = smov [#allocation5]  }
   0x3   :  { %s16_s10 = sshll.u32 %s664_s9, 4  ;;  %s25_s12 = sshll.u32 %s665_s11, 4  ;;  %s17_s10 = int_to_ptr.vmem [resolvable:$true] %s16_s10  ;;  %s687_s12 = int_to_ptr.vmem [resolvable:$true] %s25_s12 }
   0x4   :  { %s592_s15 = scalar_lea.hbm %s760_s0, 128 }
   0x5   :  { %p593_p0 = scmp.ne.s32.totalorder %s760_s0, %s592_s15  ;;  %p596_p1 = scmp.lt.u32.totalorder %s592_s15, %s760_s0 }
   0x7   :  { %p598_p2 = pnand %p596_p1, %p593_p0 }
   0x9   :  { %601 = shalt.err (!%p598_p2)
}
   0xa   :  { %s602_s20 = scalar_lea.vmem %s17_s10, 128  ;;  %p607_p4 = scmp.lt.s32.totalorder %s17_s10, %s17_s10 }
   0xb   :  { %p603_p3 = scmp.ne.s32.totalorder %s17_s10, %s602_s20  ;;  %p608_p5 = scmp.lt.s32.totalorder %s602_s20, %s602_s20 }
   0xd   :  { %p609_p6 = por %p608_p5, %p607_p4 }
   0xf   :  { %p610_p7 = pnand %p609_p6, %p603_p3 }
  0x11   :  { %613 = shalt.err (!%p610_p7)
}
  0x12   :  { %19 = dma.hbm_to_vmem [thread:$0]  %s760_s0, 128, %s17_s10, [#allocation3]  }
  0x13   :  { %s614_s25 = scalar_lea.hbm %s761_s1, 6272 }
  0x14   :  { %p615_p8 = scmp.ne.s32.totalorder %s761_s1, %s614_s25  ;;  %p618_p9 = scmp.lt.u32.totalorder %s614_s25, %s761_s1 }
  0x16   :  { %p620_p10 = pnand %p618_p9, %p615_p8 }
  0x18   :  { %623 = shalt.err (!%p620_p10)
}
  0x19   :  { %s624_s30 = scalar_lea.vmem %s687_s12, 6272  ;;  %p629_p12 = scmp.lt.s32.totalorder %s687_s12, %s687_s12 }
  0x1a   :  { %p625_p11 = scmp.ne.s32.totalorder %s687_s12, %s624_s30  ;;  %p630_p13 = scmp.lt.s32.totalorder %s624_s30, %s624_s30 }
  0x1c   :  { %p631_p0 = por %p630_p13, %p629_p12 }
  0x1e   :  { %p632_p1 = pnand %p631_p0, %p625_p11 }
  0x20   :  { %635 = shalt.err (!%p632_p1)
}
  0x21   :  { %s666_s0 = smov 128   ;;  %s667_s3 = smov 8  }
  0x22   :  { %31 = dma.hbm_to_vmem [thread:$0]  %s761_s1, 6272, %s687_s12, [#allocation6], %s666_s0, %s666_s0, %s667_s3  }
  0x23   :  { %658 = dma.done.wait [#allocation3], 128  }
  0x24   :  { %659 = vsyncadd [#allocation3], 4294967168 }
  0x25   :  { %660 = dma.done.wait [#allocation6], 6272  }
  0x26   :  { %661 = vsyncadd [#allocation6], 4294961024  ;;  %v668_v0 = vmov 0.0|0.0   ;;  %vm669_vm0 = vmmov 0   ;;  %v670_v1 = vmov 0.0   ;;  %v39_v2 = vld [vmem:[#allocation5] sm:$0xff] }
  0x27   :  { %504 = vmatprep.subr.bf16.mxu0 %v668_v0  ;;  %431 = vmatprep.mubr.msk.f32.mxu0 %vm669_vm0, %v670_v1  ;;  %v40_v3 = vld [vmem:[#allocation5 + $0x8] sm:$0xff]  ;;  %v41_v4 = vld [vmem:[#allocation5 + $0x10] sm:$0xff]  ;;  %v42_v6 = vld [vmem:[#allocation5 + $0x18] sm:$0xff]  ;;  %s671_s1 = smov [#allocation7]  }
  0x28   :  { %528 = vmatprep.subr.bf16.mxu1 %v668_v0  ;;  %466 = vmatprep.mubr.msk.f32.mxu1 %vm669_vm0, %v670_v1  ;;  %v505_v5 = vpack.c.bf16 %v40_v3, %v39_v2  ;;  %v508_v7 = vpack.c.bf16 %v42_v6, %v41_v4  ;;  %v43_v8 = vld [vmem:[#allocation5 + $0x20] sm:$0xff]  ;;  %v44_v9 = vld [vmem:[#allocation5 + $0x28] sm:$0xff]  ;;  %v57_v12 = vld [vmem:[#allocation5 + $0x90] sm:$0xff]  ;;  %v88_v3 = vlaneseq  ;;  %s338_s6 = sshll.u32 %s671_s1, 4  ;;  %s339_s6 = int_to_ptr.vmem [resolvable:$true] %s338_s6 }
  0x29   :  { %v55_v10 = vld [vmem:[#allocation5 + $0x80] sm:$0xff]  ;;  %v56_v11 = vld [vmem:[#allocation5 + $0x88] sm:$0xff]  ;;  %v58_v13 = vld [vmem:[#allocation5 + $0x98] sm:$0xff]  ;;  %v511_v14 = vpack.c.bf16 %v44_v9, %v43_v8  ;;  %s636_s7 = scalar_lea.vmem %s339_s6, 128  ;;  %p641_p3 = scmp.lt.s32.totalorder %s339_s6, %s339_s6 }
  0x2a   :  { %506 = vmatpush3.bf16.msra.mxu0 %v505_v5  ;;  %v529_v15 = vpack.c.bf16 %v56_v11, %v55_v10  ;;  %v45_v16 = vld [vmem:[#allocation5 + $0x30] sm:$0xff]  ;;  %v46_v17 = vld [vmem:[#allocation5 + $0x38] sm:$0xff]  ;;  %v532_v18 = vpack.c.bf16 %v58_v13, %v57_v12  ;;  %v59_v19 = vld [vmem:[#allocation5 + $0xa0] sm:$0xff]  ;;  %v89_v4 = vshrl.u32 %v88_v3, 7  ;;  %p637_p2 = scmp.ne.s32.totalorder %s339_s6, %s636_s7  ;;  %p642_p4 = scmp.lt.s32.totalorder %s636_s7, %s636_s7 }
  0x2b   :  { %507 = vmatprep.subr.bf16.mxu0 %v668_v0  ;;  %v60_v20 = vld [vmem:[#allocation5 + $0xa8] sm:$0xff]  ;;  %v514_v21 = vpack.c.bf16 %v46_v17, %v45_v16  ;;  %v47_v22 = vld [vmem:[#allocation5 + $0x40] sm:$0xff]  ;;  %v61_v25 = vld [vmem:[#allocation5 + $0xb0] sm:$0xff] }
  0x2c   :  { %530 = vmatpush3.bf16.msra.mxu1 %v529_v15  ;;  %v48_v23 = vld [vmem:[#allocation5 + $0x48] sm:$0xff]  ;;  %v535_v24 = vpack.c.bf16 %v60_v20, %v59_v19  ;;  %v62_v26 = vld [vmem:[#allocation5 + $0xb8] sm:$0xff]  ;;  %v49_v28 = vld [vmem:[#allocation5 + $0x50] sm:$0xff]  ;;  %v90_v5 = vsub.s32 0, %v89_v4  ;;  %p643_p5 = por %p642_p4, %p641_p3 }
  0x2d   :  { %531 = vmatprep.subr.bf16.mxu1 %v668_v0  ;;  %v517_v27 = vpack.c.bf16 %v48_v23, %v47_v22  ;;  %v50_v29 = vld [vmem:[#allocation5 + $0x58] sm:$0xff]  ;;  %v538_v30 = vpack.c.bf16 %v62_v26, %v61_v25  ;;  %v63_v31 = vld [vmem:[#allocation5 + $0xc0] sm:$0xff]  ;;  %v64_v32 = vld [vmem:[#allocation5 + $0xc8] sm:$0xff] }
  0x2e   :  { %509 = vmatpush3.bf16.msra.mxu0 %v508_v7  ;;  %v520_v33 = vpack.c.bf16 %v50_v29, %v49_v28  ;;  %v51_v34 = vld [vmem:[#allocation5 + $0x60] sm:$0xff]  ;;  %v52_v35 = vld [vmem:[#allocation5 + $0x68] sm:$0xff]  ;;  %v541_v36 = vpack.c.bf16 %v64_v32, %v63_v31  ;;  %v53_v38 = vld [vmem:[#allocation5 + $0x70] sm:$0xff]  ;;  %v313_v28 = vand.u32 127, %v88_v3  ;;  %p644_p6 = pnand %p643_p5, %p637_p2 }
  0x2f   :  { %510 = vmatprep.subr.bf16.mxu0 %v668_v0  ;;  %v523_v37 = vpack.c.bf16 %v52_v35, %v51_v34  ;;  %v54_v39 = vld [vmem:[#allocation5 + $0x78] sm:$0xff]  ;;  %v65_v42 = vld [vmem:[#allocation5 + $0xd0] sm:$0xff]  ;;  %v67_v45 = vld [vmem:[#allocation5 + $0xe0] sm:$0xff] }
  0x30   :  { %533 = vmatpush3.bf16.msra.mxu1 %v532_v18  ;;  %v526_v40 = vpack.c.bf16 %v54_v39, %v53_v38  ;;  %v38_v41 = vld [vmem:[#allocation2] sm:$0xff]  ;;  %v68_v46 = vld [vmem:[#allocation5 + $0xe8] sm:$0xff]  ;;  %v69_v48 = vld [vmem:[#allocation5 + $0xf0] sm:$0xff]  ;;  %vm328_vm1 = vcmp.eq.s32.totalorder %v313_v28, 6  ;;  %vm314_vm2 = vcmp.lt.s32.totalorder %v313_v28, 6 }
  0x31   :  { %534 = vmatprep.subr.bf16.mxu1 %v668_v0  ;;  %v66_v43 = vld [vmem:[#allocation5 + $0xd8] sm:$0xff]  ;;  %v547_v47 = vpack.c.bf16 %v68_v46, %v67_v45  ;;  %v71_v51 = vld [vmem:[#allocation5 + $0x100] sm:$0xff]  ;;  %v72_v52 = vld [vmem:[#allocation5 + $0x108] sm:$0xff] }
  0x32   :  { %512 = vmatpush3.bf16.msra.mxu0 %v511_v14  ;;  %v544_v44 = vpack.c.bf16 %v66_v43, %v65_v42  ;;  %v70_v49 = vld [vmem:[#allocation5 + $0xf8] sm:$0xff]  ;;  %v73_v53 = vld [vmem:[#allocation5 + $0x110] sm:$0xff]  ;;  %v553_v54 = vpack.c.bf16 %v72_v52, %v71_v51  ;;  %v75_v57 = vld [vmem:[#allocation5 + $0x120] sm:$0xff] }
  0x33   :  { %513 = vmatprep.subr.bf16.mxu0 %v668_v0  ;;  %v550_v50 = vpack.c.bf16 %v70_v49, %v69_v48  ;;  %v74_v55 = vld [vmem:[#allocation5 + $0x118] sm:$0xff]  ;;  %v76_v58 = vld [vmem:[#allocation5 + $0x128] sm:$0xff]  ;;  %v77_v60 = vld [vmem:[#allocation5 + $0x130] sm:$0xff] }
  0x34   :  { %536 = vmatpush3.bf16.msra.mxu1 %v535_v24  ;;  %v556_v56 = vpack.c.bf16 %v74_v55, %v73_v53  ;;  %v559_v59 = vpack.c.bf16 %v76_v58, %v75_v57  ;;  %v78_v61 = vld [vmem:[#allocation5 + $0x138] sm:$0xff]  ;;  %v79_v63 = vld [vmem:[#allocation5 + $0x140] sm:$0xff]  ;;  %v81_v12 = vld [vmem:[#allocation5 + $0x150] sm:$0xff] }
  0x35   :  { %537 = vmatprep.subr.bf16.mxu1 %v668_v0  ;;  %v562_v62 = vpack.c.bf16 %v78_v61, %v77_v60  ;;  %v87_v6 = vld [vmem:[#allocation5 + $0x180] sm:$0xff]  ;;  %v82_v13 = vld [vmem:[#allocation5 + $0x158] sm:$0xff]  ;;  %v84_v16 = vld [vmem:[#allocation5 + $0x168] sm:$0xff] }
  0x36   :  { %515 = vmatpush3.bf16.msra.mxu0 %v514_v21  ;;  %v91_v7 = vrot.slane %v87_v6, %v90_v5  ;;  %v568_v14 = vpack.c.bf16 %v82_v13, %v81_v12  ;;  %v83_v15 = vld [vmem:[#allocation5 + $0x160] sm:$0xff]  ;;  %v85_v18 = vld [vmem:[#allocation5 + $0x170] sm:$0xff]  ;;  %v86_v19 = vld [vmem:[#allocation5 + $0x178] sm:$0xff]  ;;  %v165_v21 = vsub.s32 1, %v89_v4 }
  0x37   :  { %516 = vmatprep.subr.bf16.mxu0 %v668_v0  ;;  %v571_v17 = vpack.c.bf16 %v84_v16, %v83_v15  ;;  %v574_v20 = vpack.c.bf16 %v86_v19, %v85_v18 }
  0x38   :  { %539 = vmatpush3.bf16.msra.mxu1 %v538_v30  ;;  %v166_v22 = vrot.slane %v87_v6, %v165_v21 }
  0x39   :  { %540 = vmatprep.subr.bf16.mxu1 %v668_v0 }
  0x3a   :  { %518 = vmatpush3.bf16.msra.mxu0 %v517_v27  ;;  %v240_v27 = vsub.s32 2, %v89_v4 }
  0x3b   :  { %519 = vmatprep.subr.bf16.mxu0 %v668_v0 }
  0x3c   :  { %542 = vmatpush3.bf16.msra.mxu1 %v541_v36  ;;  %v241_v29 = vrot.slane %v87_v6, %v240_v27 }
  0x3d   :  { %543 = vmatprep.subr.bf16.mxu1 %v668_v0 }
  0x3e   :  { %521 = vmatpush3.bf16.msra.mxu0 %v520_v33 }
  0x3f   :  { %522 = vmatprep.subr.bf16.mxu0 %v668_v0 }
  0x40   :  { %545 = vmatpush3.bf16.msra.mxu1 %v544_v44 }
  0x41   :  { %546 = vmatprep.subr.bf16.mxu1 %v668_v0 }
  0x42   :  { %524 = vmatpush3.bf16.msra.mxu0 %v523_v37 }
  0x43   :  { %525 = vmatprep.subr.bf16.mxu0 %v668_v0 }
  0x44   :  { %548 = vmatpush3.bf16.msra.mxu1 %v547_v47 }
  0x45   :  { %549 = vmatprep.subr.bf16.mxu1 %v668_v0 }
  0x46   :  { %527 = vmatpush3.bf16.msra.mxu0 %v526_v40 }
  0x47   :  { %552 = vmatprep.subr.bf16.mxu0 %v668_v0 }
  0x48   :  { %551 = vmatpush3.bf16.msra.mxu1 %v550_v50 }
  0x49   :  { %432 = vmatmul.mubr.f32.vlgmr.msra.gmra.mrb[0].mxu0 %v38_v41 }
  0x4a   :  { %501 = vmatprep.mubr.msk.f32.mxu0 %vm669_vm0, %v670_v1  ;;  %554 = vmatpush3.bf16.msra.mxu0 %v553_v54  ;;  %v80_v1 = vld [vmem:[#allocation5 + $0x148] sm:$0xff] }
  0x4b   :  { %555 = vmatprep.subr.bf16.mxu0 %v668_v0  ;;  %v565_v2 = vpack.c.bf16 %v80_v1, %v79_v63 }
  0x4e   :  { %557 = vmatpush3.bf16.msra.mxu0 %v556_v56 }
  0x4f   :  { %558 = vmatprep.subr.bf16.mxu0 %v668_v0 }
  0x52   :  { %560 = vmatpush3.bf16.msra.mxu0 %v559_v59 }
  0x53   :  { %561 = vmatprep.subr.bf16.mxu0 %v668_v0 }
  0x56   :  { %563 = vmatpush3.bf16.msra.mxu0 %v562_v62 }
  0x57   :  { %564 = vmatprep.subr.bf16.mxu0 %v668_v0 }
  0x5a   :  { %566 = vmatpush3.bf16.msra.mxu0 %v565_v2 }
  0x5b   :  { %567 = vmatprep.subr.bf16.mxu0 %v668_v0 }
  0x5e   :  { %569 = vmatpush3.bf16.msra.mxu0 %v568_v14 }
  0x5f   :  { %570 = vmatprep.subr.bf16.mxu0 %v668_v0 }
  0x62   :  { %572 = vmatpush3.bf16.msra.mxu0 %v571_v17 }
  0x63   :  { %573 = vmatprep.subr.bf16.mxu0 %v668_v0 }
  0x66   :  { %575 = vmatpush3.bf16.msra.mxu0 %v574_v20 }
 0x11c   :  { %v158_v8 = vpop.f32.mrb[0].mxu0 }
 0x11d   :  { %v159_v9 = vadd.f32 %v158_v8, %v91_v7  ;;  %v433_v10 = vpop.f32.mrb[1].mxu0 }
 0x11f   :  { %584 = vtanh.f32 %v159_v9 }
 0x129   :  { %v585_v11 = vpop.eup %584 }
 0x12a   :  { %467 = vmatmul.mubr.f32.vlgmr.msra.gmra.mrb[0].mxu1 %v585_v11 }
 0x1fd   :  { %v233_v23 = vpop.f32.mrb[0].mxu1 }
 0x1fe   :  { %v234_v24 = vadd.f32 %v233_v23, %v166_v22  ;;  %v468_v25 = vpop.f32.mrb[1].mxu1 }
 0x200   :  { %586 = vtanh.f32 %v234_v24 }
 0x20a   :  { %v587_v26 = vpop.eup %586 }
 0x20b   :  { %502 = vmatmul.mubr.f32.vlgmr.msra.gmra.mrb[2].mxu0 %v587_v26 }
 0x2de   :  { %v308_v30 = vpop.f32.mrb[2].mxu0 }
 0x2df   :  { %v309_v31 = vadd.f32 %v308_v30, %v241_v29  ;;  %v503_v32 = vpop.f32.mrb[3].mxu0 }
 0x2e1   :  { %v329_v33 = vsel %vm328_vm1, %v309_v31, 0.0  ;;  %v315_v34 = vsel %vm314_vm2, %v309_v31, -1e+30 }
 0x2e2   :  { %316 = vmax.xlane.f32.xlu0 %v315_v34 }
 0x36f   :  { %v317_v0 = vpop.xlane.xlu0 %316 }
 0x370   :  { %v318_v35 = vsub.f32 %v315_v34, %v317_v0 }
 0x372   :  { %v319_v36 = vmul.f32 1.442695, %v318_v35 }
 0x374   :  { %588 = vpow2.f32 %v319_v36 }
 0x37e   :  { %v589_v37 = vpop.eup %588 }
 0x37f   :  { %321 = vadd.xlane.f32.xlu0 %v589_v37 }
 0x40c   :  { %v322_v38 = vpop.xlane.xlu0 %321 }
 0x40d   :  { %590 = vrcp.f32 %v322_v38 }
 0x417   :  { %v591_v39 = vpop.eup %590 }
 0x418   :  { %v324_v40 = vmul.f32 %v591_v39, %v322_v38 }
 0x41a   :  { %v325_v41 = vsub.f32 2.0, %v324_v40 }
 0x41c   :  { %v326_v42 = vmul.f32 %v591_v39, %v325_v41 }
 0x41e   :  { %v327_v43 = vmul.f32 %v589_v37, %v326_v42 }
 0x420   :  { %v330_v44 = vadd.f32 %v329_v33, %v327_v43 }
 0x422   :  { %331 = vst [vmem:[#allocation7] sm:$0xff] %v330_v44 }
 0x423   :  { %647 = shalt.err (!%p644_p6)
}
 0x424   :  { %s648_s10 = scalar_lea.hbm %s762_s2, 128 }
 0x425   :  { %p649_p7 = scmp.ne.s32.totalorder %s762_s2, %s648_s10  ;;  %p652_p8 = scmp.lt.u32.totalorder %s648_s10, %s762_s2 }
 0x427   :  { %p654_p9 = pnand %p652_p8, %p649_p7 }
 0x429   :  { %657 = shalt.err (!%p654_p9)
}
 0x42a   :  { %341 = dma.vmem_to_hbm [thread:$0]  %s339_s6, 128, %s762_s2, [#allocation4]  }
 0x42b   :  { %662 = dma.done.wait [#allocation4], 128  }
 0x42c   :  { %663 = vsyncadd [#allocation4], 4294967168 }
 0x42d   :  { %345 = vsyncpa [#allocation3], 1 }
 0x42e   :  { %346 = vsyncpa [#allocation6], 1 }
 0x42f   :  { %347 = vsyncpa [#allocation4], 1 }

</bundles_post_ra>
